<compile_context>
chip_gen: v7x
topology: tpu7x:2x2x1
jax: 0.10.0
libtpu: 0.0.40
codegen_flags: <defaults>
</compile_context>

<pallas_src>
import numpy as np
import jax
import jax.numpy as jnp
from jax.experimental import pallas as pl
from jax.experimental.pallas import tpu as pltpu

K_SIZE = 41
HALF = K_SIZE // 2          # 20
HALO = 64                   # per-side halo: >= HALF and 2*HALO = 128 keeps lanes aligned
NEG = -1e30                 # pad value: can never beat the 0 floor


def _dilation1d_kernel(h_ref, w_ref, o_ref):
    # h_ref: (1, K_SIZE) f32 SMEM     -- SE weights h[t] = -(t-20)^2 / (4*scale)
    # w_ref: (R, T + 2*HALO) f32 VMEM -- R overlapping windows, one output tile per row
    # o_ref: (R, T) f32 VMEM
    win = w_ref[...]                    # load once; taps are static lane-offset slices
    rows, wlen = win.shape
    t_out = wlen - 2 * HALO

    # The reference loop starts its max at 0 -> accumulator starts at 0 (output floor).
    acc = jnp.zeros((rows, t_out), jnp.float32)

    # 41-tap unrolled shift + add + max.
    for t in range(K_SIZE):
        y = t - HALF                    # out[x] looks at input[x - y]
        off = HALO - y                  # window-local start for this tap (44..84)
        acc = jnp.maximum(acc, win[:, off:off + t_out] + h_ref[0, t])

    o_ref[...] = acc


def _round_up(a, b):
    return (a + b - 1) // b * b


def dilation1d(x, scale, *, tile=512, rows_per_block=8):
    """1-D grayscale dilation with parabolic SE. x: (N,) f32, scale: scalar > 0."""
    n = x.shape[0]
    x = x.astype(jnp.float32)
    scale = jnp.asarray(scale, dtype=jnp.float32)

    # Lane-aligned output tile; shrink for small signals so we don't over-compute.
    tile = max(2 * HALO, min(tile, _round_up(pl.cdiv(n, rows_per_block), 128)))
    n_tiles = pl.cdiv(n, tile)
    if n_tiles >= rows_per_block:
        n_rows = _round_up(n_tiles, rows_per_block)
    else:                               # tiny signal: one grid step, block rows = full dim
        rows_per_block = n_tiles
        n_rows = n_tiles
    n_cols = tile + 2 * HALO

    # Structuring-element weights, computed once here (divide leaves the hot path).
    yv = jnp.arange(-HALF, HALF + 1, dtype=jnp.float32)
    h = (-(yv * yv) / (4.0 * scale)).reshape(1, K_SIZE)

    # Overlapping windows via reshape + slice + concat (no gather):
    #   windows[r, c] = x_pad[r*tile + c], with x_pad[HALO + p] = x[p], NEG elsewhere.
    # tile >= 2*HALO, so one extra row of the reshape covers every right-hand halo.
    pad_len = (n_rows + 1) * tile
    x_pad = jnp.full((pad_len,), NEG, dtype=jnp.float32).at[HALO:HALO + n].set(x)
    x2 = x_pad.reshape(n_rows + 1, tile)
    windows = jnp.concatenate([x2[:n_rows], x2[1:, :2 * HALO]], axis=1)  # (n_rows, n_cols)

    grid = (n_rows // rows_per_block,)
    out2d = pl.pallas_call(
        _dilation1d_kernel,
        out_shape=jax.ShapeDtypeStruct((n_rows, tile), jnp.float32),
        grid=grid,
        in_specs=[
            pl.BlockSpec((1, K_SIZE), lambda i: (0, 0),
                         memory_space=pltpu.MemorySpace.SMEM),
            pl.BlockSpec((rows_per_block, n_cols), lambda i: (i, 0)),
        ],
        out_specs=pl.BlockSpec((rows_per_block, tile), lambda i: (i, 0)),
        compiler_params=pltpu.CompilerParams(
            dimension_semantics=("parallel",)),
    )(h, windows)

    return out2d.reshape(-1)[:n]


def _reference_dilation1d(x_np, s):
    # Direct transcription of the PyTorch loop for verification.
    n = x_np.shape[0]
    out = np.zeros_like(x_np)
    for pos in range(n):
        m = 0.0
        for i in range(K_SIZE):
            y = i - HALF
            j = pos - y
            if 0 <= j <= n - 1:
                tmp = x_np[j] + (-(float(y) ** 2) / (4.0 * s))
                if tmp > m:
                    m = tmp
        out[pos] = m
    return out


if __name__ == "__main__":
    key = jax.random.PRNGKey(0)
    N = 300                    # small 1-D signal (exercises both edges + padding)
    scale = 2.0                # deterministic init of the module's scale parameter

    x = jax.random.normal(key, (N,), dtype=jnp.float32) * 2.0

    out = dilation1d(x, scale)
    out = jax.block_until_ready(out)

    ref = _reference_dilation1d(np.asarray(x), scale)
    np.testing.assert_allclose(np.asarray(out), ref, rtol=1e-5, atol=1e-5)

    print("KERNEL_OK")
</pallas_src>

<mosaic_0001>
module attributes {stable_mosaic.version = 11 : i64} {
  func.func @_dilation1d_kernel(%arg0: i32, %arg1: memref<1x41xf32, #tpu.memory_space<smem>>, %arg2: memref<3x256xf32, #tpu.memory_space<vmem>>, %arg3: memref<3x128xf32, #tpu.memory_space<vmem>>) attributes {dimension_semantics = [#tpu.dimension_semantics<parallel>], iteration_bounds = array<i64: 1>, scalar_prefetch = 0 : i64, scratch_operands = 0 : i64, tpu.core_type = #tpu.core_type<tc>, window_params = [{transform_indices = @transform_0, window_bounds = array<i64: 1, 41>}, {transform_indices = @transform_1, window_bounds = array<i64: 3, 256>}, {transform_indices = @transform_2, window_bounds = array<i64: 3, 128>}]} {
    %c0 = arith.constant 0 : index
    %c0_0 = arith.constant 0 : index
    %0 = vector.load %arg2[%c0, %c0_0] : memref<3x256xf32, #tpu.memory_space<vmem>>, vector<3x256xf32>
    %cst = arith.constant 0.000000e+00 : f32
    %1 = vector.broadcast %cst : f32 to vector<3x128xf32>
    %2 = vector.extract_strided_slice %0 {offsets = [0, 84], sizes = [3, 128], strides = [1, 1]} : vector<3x256xf32> to vector<3x128xf32>
    %c0_1 = arith.constant 0 : index
    %c0_2 = arith.constant 0 : index
    %3 = memref.load %arg1[%c0_1, %c0_2] : memref<1x41xf32, #tpu.memory_space<smem>>
    %4 = vector.broadcast %3 : f32 to vector<3x128xf32>
    %5 = arith.addf %2, %4 : vector<3x128xf32>
    %6 = arith.maximumf %1, %5 : vector<3x128xf32>
    %7 = vector.extract_strided_slice %0 {offsets = [0, 83], sizes = [3, 128], strides = [1, 1]} : vector<3x256xf32> to vector<3x128xf32>
    %c0_3 = arith.constant 0 : index
    %c1 = arith.constant 1 : index
    %8 = memref.load %arg1[%c0_3, %c1] : memref<1x41xf32, #tpu.memory_space<smem>>
    %9 = vector.broadcast %8 : f32 to vector<3x128xf32>
    %10 = arith.addf %7, %9 : vector<3x128xf32>
    %11 = arith.maximumf %6, %10 : vector<3x128xf32>
    %12 = vector.extract_strided_slice %0 {offsets = [0, 82], sizes = [3, 128], strides = [1, 1]} : vector<3x256xf32> to vector<3x128xf32>
    %c0_4 = arith.constant 0 : index
    %c2 = arith.constant 2 : index
    %13 = memref.load %arg1[%c0_4, %c2] : memref<1x41xf32, #tpu.memory_space<smem>>
    %14 = vector.broadcast %13 : f32 to vector<3x128xf32>
    %15 = arith.addf %12, %14 : vector<3x128xf32>
    %16 = arith.maximumf %11, %15 : vector<3x128xf32>
    %17 = vector.extract_strided_slice %0 {offsets = [0, 81], sizes = [3, 128], strides = [1, 1]} : vector<3x256xf32> to vector<3x128xf32>
    %c0_5 = arith.constant 0 : index
    %c3 = arith.constant 3 : index
    %18 = memref.load %arg1[%c0_5, %c3] : memref<1x41xf32, #tpu.memory_space<smem>>
    %19 = vector.broadcast %18 : f32 to vector<3x128xf32>
    %20 = arith.addf %17, %19 : vector<3x128xf32>
    %21 = arith.maximumf %16, %20 : vector<3x128xf32>
    %22 = vector.extract_strided_slice %0 {offsets = [0, 80], sizes = [3, 128], strides = [1, 1]} : vector<3x256xf32> to vector<3x128xf32>
    %c0_6 = arith.constant 0 : index
    %c4 = arith.constant 4 : index
    %23 = memref.load %arg1[%c0_6, %c4] : memref<1x41xf32, #tpu.memory_space<smem>>
    %24 = vector.broadcast %23 : f32 to vector<3x128xf32>
    %25 = arith.addf %22, %24 : vector<3x128xf32>
    %26 = arith.maximumf %21, %25 : vector<3x128xf32>
    %27 = vector.extract_strided_slice %0 {offsets = [0, 79], sizes = [3, 128], strides = [1, 1]} : vector<3x256xf32> to vector<3x128xf32>
    %c0_7 = arith.constant 0 : index
    %c5 = arith.constant 5 : index
    %28 = memref.load %arg1[%c0_7, %c5] : memref<1x41xf32, #tpu.memory_space<smem>>
    %29 = vector.broadcast %28 : f32 to vector<3x128xf32>
    %30 = arith.addf %27, %29 : vector<3x128xf32>
    %31 = arith.maximumf %26, %30 : vector<3x128xf32>
    %32 = vector.extract_strided_slice %0 {offsets = [0, 78], sizes = [3, 128], strides = [1, 1]} : vector<3x256xf32> to vector<3x128xf32>
    %c0_8 = arith.constant 0 : index
    %c6 = arith.constant 6 : index
    %33 = memref.load %arg1[%c0_8, %c6] : memref<1x41xf32, #tpu.memory_space<smem>>
    %34 = vector.broadcast %33 : f32 to vector<3x128xf32>
    %35 = arith.addf %32, %34 : vector<3x128xf32>
    %36 = arith.maximumf %31, %35 : vector<3x128xf32>
    %37 = vector.extract_strided_slice %0 {offsets = [0, 77], sizes = [3, 128], strides = [1, 1]} : vector<3x256xf32> to vector<3x128xf32>
    %c0_9 = arith.constant 0 : index
    %c7 = arith.constant 7 : index
    %38 = memref.load %arg1[%c0_9, %c7] : memref<1x41xf32, #tpu.memory_space<smem>>
    %39 = vector.broadcast %38 : f32 to vector<3x128xf32>
    %40 = arith.addf %37, %39 : vector<3x128xf32>
    %41 = arith.maximumf %36, %40 : vector<3x128xf32>
    %42 = vector.extract_strided_slice %0 {offsets = [0, 76], sizes = [3, 128], strides = [1, 1]} : vector<3x256xf32> to vector<3x128xf32>
    %c0_10 = arith.constant 0 : index
    %c8 = arith.constant 8 : index
    %43 = memref.load %arg1[%c0_10, %c8] : memref<1x41xf32, #tpu.memory_space<smem>>
    %44 = vector.broadcast %43 : f32 to vector<3x128xf32>
    %45 = arith.addf %42, %44 : vector<3x128xf32>
    %46 = arith.maximumf %41, %45 : vector<3x128xf32>
    %47 = vector.extract_strided_slice %0 {offsets = [0, 75], sizes = [3, 128], strides = [1, 1]} : vector<3x256xf32> to vector<3x128xf32>
    %c0_11 = arith.constant 0 : index
    %c9 = arith.constant 9 : index
    %48 = memref.load %arg1[%c0_11, %c9] : memref<1x41xf32, #tpu.memory_space<smem>>
    %49 = vector.broadcast %48 : f32 to vector<3x128xf32>
    %50 = arith.addf %47, %49 : vector<3x128xf32>
    %51 = arith.maximumf %46, %50 : vector<3x128xf32>
    %52 = vector.extract_strided_slice %0 {offsets = [0, 74], sizes = [3, 128], strides = [1, 1]} : vector<3x256xf32> to vector<3x128xf32>
    %c0_12 = arith.constant 0 : index
    %c10 = arith.constant 10 : index
    %53 = memref.load %arg1[%c0_12, %c10] : memref<1x41xf32, #tpu.memory_space<smem>>
    %54 = vector.broadcast %53 : f32 to vector<3x128xf32>
    %55 = arith.addf %52, %54 : vector<3x128xf32>
    %56 = arith.maximumf %51, %55 : vector<3x128xf32>
    %57 = vector.extract_strided_slice %0 {offsets = [0, 73], sizes = [3, 128], strides = [1, 1]} : vector<3x256xf32> to vector<3x128xf32>
    %c0_13 = arith.constant 0 : index
    %c11 = arith.constant 11 : index
    %58 = memref.load %arg1[%c0_13, %c11] : memref<1x41xf32, #tpu.memory_space<smem>>
    %59 = vector.broadcast %58 : f32 to vector<3x128xf32>
    %60 = arith.addf %57, %59 : vector<3x128xf32>
    %61 = arith.maximumf %56, %60 : vector<3x128xf32>
    %62 = vector.extract_strided_slice %0 {offsets = [0, 72], sizes = [3, 128], strides = [1, 1]} : vector<3x256xf32> to vector<3x128xf32>
    %c0_14 = arith.constant 0 : index
    %c12 = arith.constant 12 : index
    %63 = memref.load %arg1[%c0_14, %c12] : memref<1x41xf32, #tpu.memory_space<smem>>
    %64 = vector.broadcast %63 : f32 to vector<3x128xf32>
    %65 = arith.addf %62, %64 : vector<3x128xf32>
    %66 = arith.maximumf %61, %65 : vector<3x128xf32>
    %67 = vector.extract_strided_slice %0 {offsets = [0, 71], sizes = [3, 128], strides = [1, 1]} : vector<3x256xf32> to vector<3x128xf32>
    %c0_15 = arith.constant 0 : index
    %c13 = arith.constant 13 : index
    %68 = memref.load %arg1[%c0_15, %c13] : memref<1x41xf32, #tpu.memory_space<smem>>
    %69 = vector.broadcast %68 : f32 to vector<3x128xf32>
    %70 = arith.addf %67, %69 : vector<3x128xf32>
    %71 = arith.maximumf %66, %70 : vector<3x128xf32>
    %72 = vector.extract_strided_slice %0 {offsets = [0, 70], sizes = [3, 128], strides = [1, 1]} : vector<3x256xf32> to vector<3x128xf32>
    %c0_16 = arith.constant 0 : index
    %c14 = arith.constant 14 : index
    %73 = memref.load %arg1[%c0_16, %c14] : memref<1x41xf32, #tpu.memory_space<smem>>
    %74 = vector.broadcast %73 : f32 to vector<3x128xf32>
    %75 = arith.addf %72, %74 : vector<3x128xf32>
    %76 = arith.maximumf %71, %75 : vector<3x128xf32>
    %77 = vector.extract_strided_slice %0 {offsets = [0, 69], sizes = [3, 128], strides = [1, 1]} : vector<3x256xf32> to vector<3x128xf32>
    %c0_17 = arith.constant 0 : index
    %c15 = arith.constant 15 : index
    %78 = memref.load %arg1[%c0_17, %c15] : memref<1x41xf32, #tpu.memory_space<smem>>
    %79 = vector.broadcast %78 : f32 to vector<3x128xf32>
    %80 = arith.addf %77, %79 : vector<3x128xf32>
    %81 = arith.maximumf %76, %80 : vector<3x128xf32>
    %82 = vector.extract_strided_slice %0 {offsets = [0, 68], sizes = [3, 128], strides = [1, 1]} : vector<3x256xf32> to vector<3x128xf32>
    %c0_18 = arith.constant 0 : index
    %c16 = arith.constant 16 : index
    %83 = memref.load %arg1[%c0_18, %c16] : memref<1x41xf32, #tpu.memory_space<smem>>
    %84 = vector.broadcast %83 : f32 to vector<3x128xf32>
    %85 = arith.addf %82, %84 : vector<3x128xf32>
    %86 = arith.maximumf %81, %85 : vector<3x128xf32>
    %87 = vector.extract_strided_slice %0 {offsets = [0, 67], sizes = [3, 128], strides = [1, 1]} : vector<3x256xf32> to vector<3x128xf32>
    %c0_19 = arith.constant 0 : index
    %c17 = arith.constant 17 : index
    %88 = memref.load %arg1[%c0_19, %c17] : memref<1x41xf32, #tpu.memory_space<smem>>
    %89 = vector.broadcast %88 : f32 to vector<3x128xf32>
    %90 = arith.addf %87, %89 : vector<3x128xf32>
    %91 = arith.maximumf %86, %90 : vector<3x128xf32>
    %92 = vector.extract_strided_slice %0 {offsets = [0, 66], sizes = [3, 128], strides = [1, 1]} : vector<3x256xf32> to vector<3x128xf32>
    %c0_20 = arith.constant 0 : index
    %c18 = arith.constant 18 : index
    %93 = memref.load %arg1[%c0_20, %c18] : memref<1x41xf32, #tpu.memory_space<smem>>
    %94 = vector.broadcast %93 : f32 to vector<3x128xf32>
    %95 = arith.addf %92, %94 : vector<3x128xf32>
    %96 = arith.maximumf %91, %95 : vector<3x128xf32>
    %97 = vector.extract_strided_slice %0 {offsets = [0, 65], sizes = [3, 128], strides = [1, 1]} : vector<3x256xf32> to vector<3x128xf32>
    %c0_21 = arith.constant 0 : index
    %c19 = arith.constant 19 : index
    %98 = memref.load %arg1[%c0_21, %c19] : memref<1x41xf32, #tpu.memory_space<smem>>
    %99 = vector.broadcast %98 : f32 to vector<3x128xf32>
    %100 = arith.addf %97, %99 : vector<3x128xf32>
    %101 = arith.maximumf %96, %100 : vector<3x128xf32>
    %102 = vector.extract_strided_slice %0 {offsets = [0, 64], sizes = [3, 128], strides = [1, 1]} : vector<3x256xf32> to vector<3x128xf32>
    %c0_22 = arith.constant 0 : index
    %c20 = arith.constant 20 : index
    %103 = memref.load %arg1[%c0_22, %c20] : memref<1x41xf32, #tpu.memory_space<smem>>
    %104 = vector.broadcast %103 : f32 to vector<3x128xf32>
    %105 = arith.addf %102, %104 : vector<3x128xf32>
    %106 = arith.maximumf %101, %105 : vector<3x128xf32>
    %107 = vector.extract_strided_slice %0 {offsets = [0, 63], sizes = [3, 128], strides = [1, 1]} : vector<3x256xf32> to vector<3x128xf32>
    %c0_23 = arith.constant 0 : index
    %c21 = arith.constant 21 : index
    %108 = memref.load %arg1[%c0_23, %c21] : memref<1x41xf32, #tpu.memory_space<smem>>
    %109 = vector.broadcast %108 : f32 to vector<3x128xf32>
    %110 = arith.addf %107, %109 : vector<3x128xf32>
    %111 = arith.maximumf %106, %110 : vector<3x128xf32>
    %112 = vector.extract_strided_slice %0 {offsets = [0, 62], sizes = [3, 128], strides = [1, 1]} : vector<3x256xf32> to vector<3x128xf32>
    %c0_24 = arith.constant 0 : index
    %c22 = arith.constant 22 : index
    %113 = memref.load %arg1[%c0_24, %c22] : memref<1x41xf32, #tpu.memory_space<smem>>
    %114 = vector.broadcast %113 : f32 to vector<3x128xf32>
    %115 = arith.addf %112, %114 : vector<3x128xf32>
    %116 = arith.maximumf %111, %115 : vector<3x128xf32>
    %117 = vector.extract_strided_slice %0 {offsets = [0, 61], sizes = [3, 128], strides = [1, 1]} : vector<3x256xf32> to vector<3x128xf32>
    %c0_25 = arith.constant 0 : index
    %c23 = arith.constant 23 : index
    %118 = memref.load %arg1[%c0_25, %c23] : memref<1x41xf32, #tpu.memory_space<smem>>
    %119 = vector.broadcast %118 : f32 to vector<3x128xf32>
    %120 = arith.addf %117, %119 : vector<3x128xf32>
    %121 = arith.maximumf %116, %120 : vector<3x128xf32>
    %122 = vector.extract_strided_slice %0 {offsets = [0, 60], sizes = [3, 128], strides = [1, 1]} : vector<3x256xf32> to vector<3x128xf32>
    %c0_26 = arith.constant 0 : index
    %c24 = arith.constant 24 : index
    %123 = memref.load %arg1[%c0_26, %c24] : memref<1x41xf32, #tpu.memory_space<smem>>
    %124 = vector.broadcast %123 : f32 to vector<3x128xf32>
    %125 = arith.addf %122, %124 : vector<3x128xf32>
    %126 = arith.maximumf %121, %125 : vector<3x128xf32>
    %127 = vector.extract_strided_slice %0 {offsets = [0, 59], sizes = [3, 128], strides = [1, 1]} : vector<3x256xf32> to vector<3x128xf32>
    %c0_27 = arith.constant 0 : index
    %c25 = arith.constant 25 : index
    %128 = memref.load %arg1[%c0_27, %c25] : memref<1x41xf32, #tpu.memory_space<smem>>
    %129 = vector.broadcast %128 : f32 to vector<3x128xf32>
    %130 = arith.addf %127, %129 : vector<3x128xf32>
    %131 = arith.maximumf %126, %130 : vector<3x128xf32>
    %132 = vector.extract_strided_slice %0 {offsets = [0, 58], sizes = [3, 128], strides = [1, 1]} : vector<3x256xf32> to vector<3x128xf32>
    %c0_28 = arith.constant 0 : index
    %c26 = arith.constant 26 : index
    %133 = memref.load %arg1[%c0_28, %c26] : memref<1x41xf32, #tpu.memory_space<smem>>
    %134 = vector.broadcast %133 : f32 to vector<3x128xf32>
    %135 = arith.addf %132, %134 : vector<3x128xf32>
    %136 = arith.maximumf %131, %135 : vector<3x128xf32>
    %137 = vector.extract_strided_slice %0 {offsets = [0, 57], sizes = [3, 128], strides = [1, 1]} : vector<3x256xf32> to vector<3x128xf32>
    %c0_29 = arith.constant 0 : index
    %c27 = arith.constant 27 : index
    %138 = memref.load %arg1[%c0_29, %c27] : memref<1x41xf32, #tpu.memory_space<smem>>
    %139 = vector.broadcast %138 : f32 to vector<3x128xf32>
    %140 = arith.addf %137, %139 : vector<3x128xf32>
    %141 = arith.maximumf %136, %140 : vector<3x128xf32>
    %142 = vector.extract_strided_slice %0 {offsets = [0, 56], sizes = [3, 128], strides = [1, 1]} : vector<3x256xf32> to vector<3x128xf32>
    %c0_30 = arith.constant 0 : index
    %c28 = arith.constant 28 : index
    %143 = memref.load %arg1[%c0_30, %c28] : memref<1x41xf32, #tpu.memory_space<smem>>
    %144 = vector.broadcast %143 : f32 to vector<3x128xf32>
    %145 = arith.addf %142, %144 : vector<3x128xf32>
    %146 = arith.maximumf %141, %145 : vector<3x128xf32>
    %147 = vector.extract_strided_slice %0 {offsets = [0, 55], sizes = [3, 128], strides = [1, 1]} : vector<3x256xf32> to vector<3x128xf32>
    %c0_31 = arith.constant 0 : index
    %c29 = arith.constant 29 : index
    %148 = memref.load %arg1[%c0_31, %c29] : memref<1x41xf32, #tpu.memory_space<smem>>
    %149 = vector.broadcast %148 : f32 to vector<3x128xf32>
    %150 = arith.addf %147, %149 : vector<3x128xf32>
    %151 = arith.maximumf %146, %150 : vector<3x128xf32>
    %152 = vector.extract_strided_slice %0 {offsets = [0, 54], sizes = [3, 128], strides = [1, 1]} : vector<3x256xf32> to vector<3x128xf32>
    %c0_32 = arith.constant 0 : index
    %c30 = arith.constant 30 : index
    %153 = memref.load %arg1[%c0_32, %c30] : memref<1x41xf32, #tpu.memory_space<smem>>
    %154 = vector.broadcast %153 : f32 to vector<3x128xf32>
    %155 = arith.addf %152, %154 : vector<3x128xf32>
    %156 = arith.maximumf %151, %155 : vector<3x128xf32>
    %157 = vector.extract_strided_slice %0 {offsets = [0, 53], sizes = [3, 128], strides = [1, 1]} : vector<3x256xf32> to vector<3x128xf32>
    %c0_33 = arith.constant 0 : index
    %c31 = arith.constant 31 : index
    %158 = memref.load %arg1[%c0_33, %c31] : memref<1x41xf32, #tpu.memory_space<smem>>
    %159 = vector.broadcast %158 : f32 to vector<3x128xf32>
    %160 = arith.addf %157, %159 : vector<3x128xf32>
    %161 = arith.maximumf %156, %160 : vector<3x128xf32>
    %162 = vector.extract_strided_slice %0 {offsets = [0, 52], sizes = [3, 128], strides = [1, 1]} : vector<3x256xf32> to vector<3x128xf32>
    %c0_34 = arith.constant 0 : index
    %c32 = arith.constant 32 : index
    %163 = memref.load %arg1[%c0_34, %c32] : memref<1x41xf32, #tpu.memory_space<smem>>
    %164 = vector.broadcast %163 : f32 to vector<3x128xf32>
    %165 = arith.addf %162, %164 : vector<3x128xf32>
    %166 = arith.maximumf %161, %165 : vector<3x128xf32>
    %167 = vector.extract_strided_slice %0 {offsets = [0, 51], sizes = [3, 128], strides = [1, 1]} : vector<3x256xf32> to vector<3x128xf32>
    %c0_35 = arith.constant 0 : index
    %c33 = arith.constant 33 : index
    %168 = memref.load %arg1[%c0_35, %c33] : memref<1x41xf32, #tpu.memory_space<smem>>
    %169 = vector.broadcast %168 : f32 to vector<3x128xf32>
    %170 = arith.addf %167, %169 : vector<3x128xf32>
    %171 = arith.maximumf %166, %170 : vector<3x128xf32>
    %172 = vector.extract_strided_slice %0 {offsets = [0, 50], sizes = [3, 128], strides = [1, 1]} : vector<3x256xf32> to vector<3x128xf32>
    %c0_36 = arith.constant 0 : index
    %c34 = arith.constant 34 : index
    %173 = memref.load %arg1[%c0_36, %c34] : memref<1x41xf32, #tpu.memory_space<smem>>
    %174 = vector.broadcast %173 : f32 to vector<3x128xf32>
    %175 = arith.addf %172, %174 : vector<3x128xf32>
    %176 = arith.maximumf %171, %175 : vector<3x128xf32>
    %177 = vector.extract_strided_slice %0 {offsets = [0, 49], sizes = [3, 128], strides = [1, 1]} : vector<3x256xf32> to vector<3x128xf32>
    %c0_37 = arith.constant 0 : index
    %c35 = arith.constant 35 : index
    %178 = memref.load %arg1[%c0_37, %c35] : memref<1x41xf32, #tpu.memory_space<smem>>
    %179 = vector.broadcast %178 : f32 to vector<3x128xf32>
    %180 = arith.addf %177, %179 : vector<3x128xf32>
    %181 = arith.maximumf %176, %180 : vector<3x128xf32>
    %182 = vector.extract_strided_slice %0 {offsets = [0, 48], sizes = [3, 128], strides = [1, 1]} : vector<3x256xf32> to vector<3x128xf32>
    %c0_38 = arith.constant 0 : index
    %c36 = arith.constant 36 : index
    %183 = memref.load %arg1[%c0_38, %c36] : memref<1x41xf32, #tpu.memory_space<smem>>
    %184 = vector.broadcast %183 : f32 to vector<3x128xf32>
    %185 = arith.addf %182, %184 : vector<3x128xf32>
    %186 = arith.maximumf %181, %185 : vector<3x128xf32>
    %187 = vector.extract_strided_slice %0 {offsets = [0, 47], sizes = [3, 128], strides = [1, 1]} : vector<3x256xf32> to vector<3x128xf32>
    %c0_39 = arith.constant 0 : index
    %c37 = arith.constant 37 : index
    %188 = memref.load %arg1[%c0_39, %c37] : memref<1x41xf32, #tpu.memory_space<smem>>
    %189 = vector.broadcast %188 : f32 to vector<3x128xf32>
    %190 = arith.addf %187, %189 : vector<3x128xf32>
    %191 = arith.maximumf %186, %190 : vector<3x128xf32>
    %192 = vector.extract_strided_slice %0 {offsets = [0, 46], sizes = [3, 128], strides = [1, 1]} : vector<3x256xf32> to vector<3x128xf32>
    %c0_40 = arith.constant 0 : index
    %c38 = arith.constant 38 : index
    %193 = memref.load %arg1[%c0_40, %c38] : memref<1x41xf32, #tpu.memory_space<smem>>
    %194 = vector.broadcast %193 : f32 to vector<3x128xf32>
    %195 = arith.addf %192, %194 : vector<3x128xf32>
    %196 = arith.maximumf %191, %195 : vector<3x128xf32>
    %197 = vector.extract_strided_slice %0 {offsets = [0, 45], sizes = [3, 128], strides = [1, 1]} : vector<3x256xf32> to vector<3x128xf32>
    %c0_41 = arith.constant 0 : index
    %c39 = arith.constant 39 : index
    %198 = memref.load %arg1[%c0_41, %c39] : memref<1x41xf32, #tpu.memory_space<smem>>
    %199 = vector.broadcast %198 : f32 to vector<3x128xf32>
    %200 = arith.addf %197, %199 : vector<3x128xf32>
    %201 = arith.maximumf %196, %200 : vector<3x128xf32>
    %202 = vector.extract_strided_slice %0 {offsets = [0, 44], sizes = [3, 128], strides = [1, 1]} : vector<3x256xf32> to vector<3x128xf32>
    %c0_42 = arith.constant 0 : index
    %c40 = arith.constant 40 : index
    %203 = memref.load %arg1[%c0_42, %c40] : memref<1x41xf32, #tpu.memory_space<smem>>
    %204 = vector.broadcast %203 : f32 to vector<3x128xf32>
    %205 = arith.addf %202, %204 : vector<3x128xf32>
    %206 = arith.maximumf %201, %205 : vector<3x128xf32>
    %c0_43 = arith.constant 0 : index
    %c0_44 = arith.constant 0 : index
    %207 = vector.load %arg3[%c0_43, %c0_44] : memref<3x128xf32, #tpu.memory_space<vmem>>, vector<3x128xf32>
    tpu.vector_store %arg3[%c0_43, %c0_44], %206 {strides = array<i32>} : memref<3x128xf32, #tpu.memory_space<vmem>>, vector<3x128xf32>,
    return
  }
  func.func @transform_0(%arg0: i32) -> (i32, i32) {
    %c0_i32 = arith.constant 0 : i32
    %c0_i32_0 = arith.constant 0 : i32
    %c0_i32_1 = arith.constant 0 : i32
    return %c0_i32, %c0_i32_0 : i32, i32
  }
  func.func @transform_1(%arg0: i32) -> (i32, i32) {
    %c0_i32 = arith.constant 0 : i32
    %c0_i32_0 = arith.constant 0 : i32
    return %arg0, %c0_i32 : i32, i32
  }
  func.func @transform_2(%arg0: i32) -> (i32, i32) {
    %c0_i32 = arith.constant 0 : i32
    %c0_i32_0 = arith.constant 0 : i32
    return %arg0, %c0_i32 : i32, i32
  }
}

</mosaic_0001>

<bundles_post_ra>
// kernel: tpu_custom_call.1
= control target key start
LH: loop header
LB: loop body
LE: loop exit
PB: predicated region body
PF: predicated region fallthrough
CT: control target
= control target key end

     0   :  { %7 = vsyncpa [#allocation5], 0  ;;  %s788_s0 = inlined_call_operand.hbm [shape: f32[1,41], index: 0, kind: input, shape index: {}]   ;;  %s789_s1 = inlined_call_operand.hbm [shape: f32[3,256], index: 1, kind: input, shape index: {}]   ;;  %s790_s2 = inlined_call_operand.hbm [shape: f32[3,128], index: 2, kind: output, shape index: {}]  }
   0x1   :  { %8 = vsyncpa [#allocation3], 0 }
   0x2   :  { %9 = vsyncpa [#allocation4], 0  ;;  %s590_s11 = scalar_lea.hbm %s788_s0, 16 }
   0x3   :  { %p591_p0 = scmp.ne.s32.totalorder %s788_s0, %s590_s11  ;;  %p594_p1 = scmp.lt.u32.totalorder %s590_s11, %s788_s0 }
   0x5   :  { %p596_p2 = pnand %p594_p1, %p591_p0 }
   0x7   :  { %599 = shalt.err (!%p596_p2)
}
   0x8   :  { %s650_s16 = smov [#allocation2]   ;;  %s651_s19 = smov [#allocation6]  }
   0x9   :  { %17 = dma.hbm_to_smem %s788_s0, 16, %s650_s16, [#allocation5]  }
   0xa   :  { %s24_s20 = sshll.u32 %s651_s19, 4  ;;  %s600_s23 = scalar_lea.hbm %s789_s1, 128  ;;  %s25_s20 = int_to_ptr.vmem [resolvable:$true] %s24_s20 }
   0xb   :  { %p601_p3 = scmp.ne.s32.totalorder %s789_s1, %s600_s23  ;;  %p604_p4 = scmp.lt.u32.totalorder %s600_s23, %s789_s1 }
   0xd   :  { %p606_p5 = pnand %p604_p4, %p601_p3 }
   0xf   :  { %609 = shalt.err (!%p606_p5)
}
  0x10   :  { %s610_s28 = scalar_lea.vmem %s25_s20, 128  ;;  %p615_p7 = scmp.lt.s32.totalorder %s25_s20, %s25_s20 }
  0x11   :  { %p611_p6 = scmp.ne.s32.totalorder %s25_s20, %s610_s28  ;;  %p616_p8 = scmp.lt.s32.totalorder %s610_s28, %s610_s28 }
  0x13   :  { %p617_p9 = por %p616_p8, %p615_p7 }
  0x15   :  { %p618_p10 = pnand %p617_p9, %p611_p6 }
  0x17   :  { %621 = shalt.err (!%p618_p10)
}
  0x18   :  { %27 = dma.hbm_to_vmem [thread:$0]  %s789_s1, 128, %s25_s20, [#allocation3]  }
  0x19   :  { %644 = dma.done.wait [#allocation5], 16  }
  0x1a   :  { %645 = vsyncadd [#allocation5], 4294967280 }
  0x1b   :  { %646 = dma.done.wait [#allocation3], 128  }
  0x1c   :  { %647 = vsyncadd [#allocation3], 4294967168 }
  0x1d   :  { %34 = sfence }
  0x1e   :  { %s506_s30 = sld [smem:[#allocation2 + $0x1]]  ;;  %s508_s3 = sld [smem:[#allocation2 + $0x3]]  ;;  %v733_v0 = vld [vmem:[#allocation6] sm:$0x77]  ;;  %vm47_vm0 = vcmask 7168   ;;  %vm58_vm1 = vcmask 15360  }
  0x1f   :  { %s507_s4 = sld [smem:[#allocation2 + $0x2]]  ;;  %s509_s5 = sld [smem:[#allocation2 + $0x4]]  ;;  %vm69_vm2 = vcmask 23552   ;;  %vm80_vm3 = vcmask 31744   ;;  %vm91_vm4 = vcmask 39936   ;;  %vm102_vm5 = vcmask 48128  }
  0x20   :  { %s510_s6 = sld [smem:[#allocation2 + $0x5]]  ;;  %s511_s7 = sld [smem:[#allocation2 + $0x6]]  ;;  %vm113_vm6 = vcmask 56320   ;;  %vm124_vm7 = vcmask 64512   ;;  %vm135_vm8 = vcmask 72704   ;;  %vm146_vm9 = vcmask 80896  }
  0x21   :  { %s512_s8 = sld [smem:[#allocation2 + $0x7]]  ;;  %s513_s9 = sld [smem:[#allocation2 + $0x8]]  ;;  %vm157_vm10 = vcmask 89088   ;;  %vm168_vm11 = vcmask 97280   ;;  %vm179_vm12 = vcmask 105472   ;;  %vm190_vm13 = vcmask 113664  }
  0x22   :  { %s652_s1 = smov 1   ;;  %s653_s10 = smov 3   ;;  %vm201_vm14 = vcmask 121856   ;;  %vm212_vm15 = vcmask 130048  }
  0x23   :  { %s514_s11 = sld [smem:[#allocation2 + $0x9]]  ;;  %s515_s12 = sld [smem:[#allocation2 + $0xa]] }
  0x24   :  { %v41_v1 = vstv %s506_s30  ;;  %v63_v3 = vstv %s508_s3  ;;  %s654_s13 = smov 2   ;;  %s655_s14 = smov 4  }
  0x25   :  { %v42_v2 = vadd.f32 %v41_v1, %v733_v0  ;;  %v64_v4 = vadd.f32 %v63_v3, %v733_v0  ;;  %v52_v5 = vstv %s507_s4  ;;  %v74_v7 = vstv %s509_s5  ;;  %s516_s15 = sld [smem:[#allocation2 + $0xb]]  ;;  %s517_s16 = sld [smem:[#allocation2 + $0xc]] }
  0x26   :  { %v53_v6 = vadd.f32 %v52_v5, %v733_v0  ;;  %v75_v8 = vadd.f32 %v74_v7, %v733_v0  ;;  %v85_v9 = vstv %s510_s6  ;;  %v96_v10 = vstv %s511_s7  ;;  %s656_s17 = smov 5   ;;  %s657_s18 = smov 6  }
  0x27   :  { %44 = vrot.lane.b32.xlu0 %v42_v2, %s652_s1  ;;  %66 = vrot.lane.b32.xlu1 %v64_v4, %s653_s10  ;;  %v86_v11 = vadd.f32 %v85_v9, %v733_v0  ;;  %v97_v12 = vadd.f32 %v96_v10, %v733_v0  ;;  %v107_v13 = vstv %s512_s8  ;;  %v118_v14 = vstv %s513_s9  ;;  %s518_s19 = sld [smem:[#allocation2 + $0xd]]  ;;  %s519_s20 = sld [smem:[#allocation2 + $0xe]] }
  0x28   :  { %v108_v15 = vadd.f32 %v107_v13, %v733_v0  ;;  %v119_v16 = vadd.f32 %v118_v14, %v733_v0  ;;  %s658_s21 = smov 7   ;;  %s659_s22 = smov 8  }
  0x29   :  { %v129_v17 = vstv %s514_s11  ;;  %v140_v18 = vstv %s515_s12  ;;  %s520_s23 = sld [smem:[#allocation2 + $0xf]]  ;;  %s521_s24 = sld [smem:[#allocation2 + $0x10]] }
  0x2a   :  { %v130_v19 = vadd.f32 %v129_v17, %v733_v0  ;;  %v141_v20 = vadd.f32 %v140_v18, %v733_v0  ;;  %s660_s25 = smov 9   ;;  %s661_s26 = smov 10  }
  0x2b   :  { %55 = vrot.lane.b32.xlu0 %v53_v6, %s654_s13  ;;  %77 = vrot.lane.b32.xlu1 %v75_v8, %s655_s14  ;;  %v151_v21 = vstv %s516_s15  ;;  %v162_v22 = vstv %s517_s16  ;;  %s522_s27 = sld [smem:[#allocation2 + $0x11]]  ;;  %s523_s28 = sld [smem:[#allocation2 + $0x12]] }
  0x2c   :  { %v152_v23 = vadd.f32 %v151_v21, %v733_v0  ;;  %v163_v24 = vadd.f32 %v162_v22, %v733_v0  ;;  %s662_s0 = smov 11   ;;  %s663_s29 = smov 12  }
  0x2d   :  { %v173_v25 = vstv %s518_s19  ;;  %v184_v26 = vstv %s519_s20  ;;  %s524_s30 = sld [smem:[#allocation2 + $0x13]]  ;;  %s525_s3 = sld [smem:[#allocation2 + $0x14]] }
  0x2e   :  { %v174_v27 = vadd.f32 %v173_v25, %v733_v0  ;;  %v185_v28 = vadd.f32 %v184_v26, %v733_v0  ;;  %s664_s4 = smov 13   ;;  %s665_s5 = smov 14  }
  0x2f   :  { %88 = vrot.lane.b32.xlu0 %v86_v11, %s656_s17  ;;  %99 = vrot.lane.b32.xlu1 %v97_v12, %s657_s18  ;;  %v195_v29 = vstv %s520_s23  ;;  %v206_v30 = vstv %s521_s24  ;;  %s526_s6 = sld [smem:[#allocation2 + $0x15]]  ;;  %s527_s7 = sld [smem:[#allocation2 + $0x16]] }
  0x30   :  { %v196_v31 = vadd.f32 %v195_v29, %v733_v0  ;;  %v207_v32 = vadd.f32 %v206_v30, %v733_v0  ;;  %s666_s8 = smov 15   ;;  %s667_s9 = smov 16  }
  0x31   :  { %v217_v33 = vstv %s522_s27  ;;  %v228_v34 = vstv %s523_s28  ;;  %s528_s1 = sld [smem:[#allocation2 + $0x17]]  ;;  %s529_s10 = sld [smem:[#allocation2 + $0x18]] }
  0x32   :  { %v218_v35 = vadd.f32 %v217_v33, %v733_v0  ;;  %v229_v36 = vadd.f32 %v228_v34, %v733_v0  ;;  %s668_s11 = smov 17   ;;  %s669_s12 = smov 18  }
  0x33   :  { %110 = vrot.lane.b32.xlu0 %v108_v15, %s658_s21  ;;  %121 = vrot.lane.b32.xlu1 %v119_v16, %s659_s22  ;;  %v239_v37 = vstv %s524_s30  ;;  %v250_v38 = vstv %s525_s3  ;;  %s530_s13 = sld [smem:[#allocation2 + $0x19]]  ;;  %s531_s14 = sld [smem:[#allocation2 + $0x1a]] }
  0x34   :  { %v240_v39 = vadd.f32 %v239_v37, %v733_v0  ;;  %v251_v40 = vadd.f32 %v250_v38, %v733_v0  ;;  %s670_s15 = smov 19   ;;  %s671_s16 = smov 20  }
  0x35   :  { %v261_v41 = vstv %s526_s6  ;;  %v272_v42 = vstv %s527_s7  ;;  %s532_s17 = sld [smem:[#allocation2 + $0x1b]]  ;;  %s533_s18 = sld [smem:[#allocation2 + $0x1c]] }
  0x36   :  { %v262_v43 = vadd.f32 %v261_v41, %v733_v0  ;;  %v273_v44 = vadd.f32 %v272_v42, %v733_v0  ;;  %s672_s19 = smov 21   ;;  %s673_s20 = smov 22  }
  0x37   :  { %132 = vrot.lane.b32.xlu0 %v130_v19, %s660_s25  ;;  %143 = vrot.lane.b32.xlu1 %v141_v20, %s661_s26  ;;  %v283_v45 = vstv %s528_s1  ;;  %v294_v46 = vstv %s529_s10  ;;  %s534_s21 = sld [smem:[#allocation2 + $0x1d]]  ;;  %s535_s22 = sld [smem:[#allocation2 + $0x1e]] }
  0x38   :  { %v284_v47 = vadd.f32 %v283_v45, %v733_v0  ;;  %v295_v48 = vadd.f32 %v294_v46, %v733_v0  ;;  %s674_s23 = smov 23   ;;  %s675_s24 = smov 24  }
  0x39   :  { %v305_v49 = vstv %s530_s13  ;;  %v316_v50 = vstv %s531_s14  ;;  %s536_s25 = sld [smem:[#allocation2 + $0x1f]]  ;;  %s537_s26 = sld [smem:[#allocation2 + $0x20]] }
  0x3a   :  { %v306_v51 = vadd.f32 %v305_v49, %v733_v0  ;;  %v317_v52 = vadd.f32 %v316_v50, %v733_v0  ;;  %s676_s27 = smov 25   ;;  %s677_s28 = smov 26  }
  0x3b   :  { %154 = vrot.lane.b32.xlu0 %v152_v23, %s662_s0  ;;  %165 = vrot.lane.b32.xlu1 %v163_v24, %s663_s29  ;;  %v327_v53 = vstv %s532_s17  ;;  %v338_v54 = vstv %s533_s18  ;;  %s538_s0 = sld [smem:[#allocation2 + $0x21]]  ;;  %s539_s29 = sld [smem:[#allocation2 + $0x22]] }
  0x3c   :  { %v328_v55 = vadd.f32 %v327_v53, %v733_v0  ;;  %v339_v56 = vadd.f32 %v338_v54, %v733_v0  ;;  %s678_s30 = smov 27   ;;  %s679_s3 = smov 28  }
  0x3d   :  { %v349_v57 = vstv %s534_s21  ;;  %v360_v58 = vstv %s535_s22  ;;  %s680_s6 = smov 29   ;;  %s681_s7 = smov 30  }
  0x3e   :  { %v350_v59 = vadd.f32 %v349_v57, %v733_v0  ;;  %v361_v60 = vadd.f32 %v360_v58, %v733_v0  ;;  %s682_s1 = smov 31   ;;  %s683_s10 = smov 32  }
  0x3f   :  { %176 = vrot.lane.b32.xlu0 %v174_v27, %s664_s4  ;;  %187 = vrot.lane.b32.xlu1 %v185_v28, %s665_s5  ;;  %v371_v61 = vstv %s536_s25  ;;  %s540_s4 = sld [smem:[#allocation2 + $0x23]]  ;;  %v382_v62 = vstv %s537_s26  ;;  %s541_s5 = sld [smem:[#allocation2 + $0x24]] }
  0x40   :  { %v372_v63 = vadd.f32 %v371_v61, %v733_v0  ;;  %v383_v1 = vadd.f32 %v382_v62, %v733_v0  ;;  %s684_s13 = smov 33   ;;  %s685_s14 = smov 34  }
  0x41   :  { %v393_v2 = vstv %s538_s0  ;;  %v404_v3 = vstv %s539_s29  ;;  %s688_s17 = smov 37   ;;  %s689_s18 = smov 38  }
  0x42   :  { %v394_v4 = vadd.f32 %v393_v2, %v733_v0  ;;  %v405_v5 = vadd.f32 %v404_v3, %v733_v0  ;;  %s36_s21 = sld [smem:[#allocation2]]  ;;  %s692_s22 = smov 44  }
  0x43   :  { %198 = vrot.lane.b32.xlu0 %v196_v31, %s666_s8  ;;  %209 = vrot.lane.b32.xlu1 %v207_v32, %s667_s9  ;;  %s542_s8 = sld [smem:[#allocation2 + $0x25]]  ;;  %s543_s9 = sld [smem:[#allocation2 + $0x26]] }
  0x45   :  { %v415_v6 = vstv %s540_s4  ;;  %v426_v7 = vstv %s541_s5 }
  0x46   :  { %v416_v8 = vadd.f32 %v415_v6, %v733_v0  ;;  %v427_v9 = vadd.f32 %v426_v7, %v733_v0 }
  0x47   :  { %220 = vrot.lane.b32.xlu0 %v218_v35, %s668_s11  ;;  %231 = vrot.lane.b32.xlu1 %v229_v36, %s669_s12  ;;  %s544_s11 = sld [smem:[#allocation2 + $0x27]]  ;;  %s545_s12 = sld [smem:[#allocation2 + $0x28]] }
  0x48   :  { %v37_v18 = vstv %s36_s21 }
  0x49   :  { %v437_v10 = vstv %s542_s8  ;;  %v448_v11 = vstv %s543_s9  ;;  %v38_v19 = vadd.f32 %v37_v18, %v733_v0 }
  0x4a   :  { %v438_v12 = vadd.f32 %v437_v10, %v733_v0  ;;  %v449_v13 = vadd.f32 %v448_v11, %v733_v0 }
  0x4b   :  { %242 = vrot.lane.b32.xlu0 %v240_v39, %s670_s15  ;;  %253 = vrot.lane.b32.xlu1 %v251_v40, %s671_s16  ;;  %s686_s15 = smov 35   ;;  %s687_s16 = smov 36   ;;  %v39_v23 = vmax.f32 %v38_v19, 0.0 }
  0x4d   :  { %v459_v14 = vstv %s544_s11  ;;  %v470_v15 = vstv %s545_s12 }
  0x4e   :  { %v460_v16 = vadd.f32 %v459_v14, %v733_v0  ;;  %v471_v17 = vadd.f32 %v470_v15, %v733_v0 }
  0x4f   :  { %264 = vrot.lane.b32.xlu0 %v262_v43, %s672_s19  ;;  %275 = vrot.lane.b32.xlu1 %v273_v44, %s673_s20  ;;  %s690_s19 = smov 39   ;;  %s691_s20 = smov 40  }
  0x53   :  { %286 = vrot.lane.b32.xlu0 %v284_v47, %s674_s23  ;;  %297 = vrot.lane.b32.xlu1 %v295_v48, %s675_s24  ;;  %s693_s23 = smov [#allocation7]  }
  0x54   :  { %s496_s24 = sshll.u32 %s693_s23, 4  ;;  %s497_s24 = int_to_ptr.vmem [resolvable:$true] %s496_s24 }
  0x55   :  { %s622_s25 = scalar_lea.vmem %s497_s24, 64  ;;  %p627_p12 = scmp.lt.s32.totalorder %s497_s24, %s497_s24 }
  0x56   :  { %p623_p11 = scmp.ne.s32.totalorder %s497_s24, %s622_s25  ;;  %p628_p13 = scmp.lt.s32.totalorder %s622_s25, %s622_s25 }
  0x57   :  { %308 = vrot.lane.b32.xlu0 %v306_v51, %s676_s27  ;;  %319 = vrot.lane.b32.xlu1 %v317_v52, %s677_s28 }
  0x58   :  { %p629_p0 = por %p628_p13, %p627_p12 }
  0x5a   :  { %p630_p1 = pnand %p629_p0, %p623_p11 }
  0x5b   :  { %330 = vrot.lane.b32.xlu0 %v328_v55, %s678_s30  ;;  %341 = vrot.lane.b32.xlu1 %v339_v56, %s679_s3 }
  0x5f   :  { %352 = vrot.lane.b32.xlu0 %v350_v59, %s680_s6  ;;  %363 = vrot.lane.b32.xlu1 %v361_v60, %s681_s7 }
  0x63   :  { %374 = vrot.lane.b32.xlu0 %v372_v63, %s682_s1  ;;  %385 = vrot.lane.b32.xlu1 %v383_v1, %s683_s10 }
  0x67   :  { %396 = vrot.lane.b32.xlu0 %v394_v4, %s684_s13  ;;  %407 = vrot.lane.b32.xlu1 %v405_v5, %s685_s14 }
  0x6b   :  { %418 = vrot.lane.b32.xlu0 %v416_v8, %s686_s15  ;;  %429 = vrot.lane.b32.xlu1 %v427_v9, %s687_s16 }
  0x6f   :  { %440 = vrot.lane.b32.xlu0 %v438_v12, %s688_s17  ;;  %451 = vrot.lane.b32.xlu1 %v449_v13, %s689_s18 }
  0x73   :  { %462 = vrot.lane.b32.xlu0 %v460_v16, %s690_s19  ;;  %473 = vrot.lane.b32.xlu1 %v471_v17, %s691_s20 }
  0x99   :  { %v45_v20 = vpop.permute.xlu0 %44  ;;  %v67_v22 = vpop.permute.xlu1 %66 }
  0x9a   :  { %v46_v21 = vrot.slane %v45_v20, 4  ;;  %v68_v26 = vrot.slane %v67_v22, 4 }
  0x9c   :  { %v48_v24 = vsel %vm47_vm0, %v46_v21, %v45_v20  ;;  %v70_v34 = vsel %vm69_vm2, %v68_v26, %v67_v22  ;;  %vm223_vm0 = vcmask 138240   ;;  %vm245_vm2 = vcmask 154624  }
  0x9d   :  { %v56_v25 = vpop.permute.xlu0 %55  ;;  %v78_v28 = vpop.permute.xlu1 %77  ;;  %v50_v29 = vmax.f32 %v39_v23, %v48_v24 }
  0x9e   :  { %v57_v27 = vrot.slane %v56_v25, 4  ;;  %v79_v31 = vrot.slane %v78_v28, 4 }
  0xa0   :  { %v59_v30 = vsel %vm58_vm1, %v57_v27, %v56_v25  ;;  %v81_v37 = vsel %vm80_vm3, %v79_v31, %v78_v28  ;;  %vm234_vm1 = vcmask 146432   ;;  %vm256_vm3 = vcmask 162816  }
  0xa1   :  { %v61_v32 = vmax.f32 %v50_v29, %v59_v30  ;;  %v89_v33 = vpop.permute.xlu0 %88  ;;  %v100_v35 = vpop.permute.xlu1 %99 }
  0xa2   :  { %v90_v0 = vrot.slane %v89_v33, 4  ;;  %v101_v38 = vrot.slane %v100_v35, 4 }
  0xa3   :  { %v72_v36 = vmax.f32 %v61_v32, %v70_v34 }
  0xa4   :  { %v92_v41 = vsel %vm91_vm4, %v90_v0, %v89_v33  ;;  %v103_v45 = vsel %vm102_vm5, %v101_v38, %v100_v35  ;;  %vm267_vm4 = vcmask 171008   ;;  %vm278_vm5 = vcmask 179200  }
  0xa5   :  { %v83_v39 = vmax.f32 %v72_v36, %v81_v37  ;;  %v111_v40 = vpop.permute.xlu0 %110  ;;  %v122_v43 = vpop.permute.xlu1 %121 }
  0xa6   :  { %v112_v42 = vrot.slane %v111_v40, 4  ;;  %v123_v46 = vrot.slane %v122_v43, 4 }
  0xa7   :  { %v94_v44 = vmax.f32 %v83_v39, %v92_v41 }
  0xa8   :  { %v114_v49 = vsel %vm113_vm6, %v112_v42, %v111_v40  ;;  %v125_v53 = vsel %vm124_vm7, %v123_v46, %v122_v43  ;;  %vm289_vm6 = vcmask 187392   ;;  %vm300_vm7 = vcmask 195584  }
  0xa9   :  { %v105_v47 = vmax.f32 %v94_v44, %v103_v45  ;;  %v133_v48 = vpop.permute.xlu0 %132  ;;  %v144_v51 = vpop.permute.xlu1 %143 }
  0xaa   :  { %v134_v50 = vrot.slane %v133_v48, 4  ;;  %v145_v54 = vrot.slane %v144_v51, 4 }
  0xab   :  { %v116_v52 = vmax.f32 %v105_v47, %v114_v49 }
  0xac   :  { %v136_v57 = vsel %vm135_vm8, %v134_v50, %v133_v48  ;;  %v147_v61 = vsel %vm146_vm9, %v145_v54, %v144_v51  ;;  %vm311_vm8 = vcmask 203776   ;;  %vm322_vm9 = vcmask 211968  }
  0xad   :  { %v127_v55 = vmax.f32 %v116_v52, %v125_v53  ;;  %v155_v56 = vpop.permute.xlu0 %154  ;;  %v166_v59 = vpop.permute.xlu1 %165 }
  0xae   :  { %v156_v58 = vrot.slane %v155_v56, 4  ;;  %v167_v62 = vrot.slane %v166_v59, 4 }
  0xaf   :  { %v138_v60 = vmax.f32 %v127_v55, %v136_v57 }
  0xb0   :  { %v158_v2 = vsel %vm157_vm10, %v156_v58, %v155_v56  ;;  %v169_v6 = vsel %vm168_vm11, %v167_v62, %v166_v59  ;;  %vm333_vm10 = vcmask 220160   ;;  %vm344_vm11 = vcmask 228352  }
  0xb1   :  { %v149_v63 = vmax.f32 %v138_v60, %v147_v61  ;;  %v177_v1 = vpop.permute.xlu0 %176  ;;  %v188_v4 = vpop.permute.xlu1 %187 }
  0xb2   :  { %v178_v3 = vrot.slane %v177_v1, 4  ;;  %v189_v7 = vrot.slane %v188_v4, 4 }
  0xb3   :  { %v160_v5 = vmax.f32 %v149_v63, %v158_v2 }
  0xb4   :  { %v180_v10 = vsel %vm179_vm12, %v178_v3, %v177_v1  ;;  %v191_v14 = vsel %vm190_vm13, %v189_v7, %v188_v4  ;;  %vm355_vm12 = vcmask 236544   ;;  %vm366_vm13 = vcmask 244736  }
  0xb5   :  { %v171_v8 = vmax.f32 %v160_v5, %v169_v6  ;;  %v199_v9 = vpop.permute.xlu0 %198  ;;  %v210_v12 = vpop.permute.xlu1 %209 }
  0xb6   :  { %v200_v11 = vrot.slane %v199_v9, 4  ;;  %v211_v15 = vrot.slane %v210_v12, 4 }
  0xb7   :  { %v182_v13 = vmax.f32 %v171_v8, %v180_v10 }
  0xb8   :  { %v202_v18 = vsel %vm201_vm14, %v200_v11, %v199_v9  ;;  %v213_v22 = vsel %vm212_vm15, %v211_v15, %v210_v12  ;;  %vm377_vm14 = vcmask 252928   ;;  %vm388_vm15 = vcmask 261120  }
  0xb9   :  { %v193_v16 = vmax.f32 %v182_v13, %v191_v14  ;;  %v221_v17 = vpop.permute.xlu0 %220  ;;  %v232_v20 = vpop.permute.xlu1 %231 }
  0xba   :  { %v222_v19 = vrot.slane %v221_v17, 4  ;;  %v233_v23 = vrot.slane %v232_v20, 4 }
  0xbb   :  { %v204_v21 = vmax.f32 %v193_v16, %v202_v18 }
  0xbc   :  { %v224_v26 = vsel %vm223_vm0, %v222_v19, %v221_v17  ;;  %v235_v30 = vsel %vm234_vm1, %v233_v23, %v232_v20  ;;  %vm399_vm0 = vcmask 269312   ;;  %vm410_vm1 = vcmask 277504  }
  0xbd   :  { %v215_v24 = vmax.f32 %v204_v21, %v213_v22  ;;  %v243_v25 = vpop.permute.xlu0 %242  ;;  %v254_v28 = vpop.permute.xlu1 %253 }
  0xbe   :  { %v244_v27 = vrot.slane %v243_v25, 4  ;;  %v255_v31 = vrot.slane %v254_v28, 4 }
  0xbf   :  { %v226_v29 = vmax.f32 %v215_v24, %v224_v26 }
  0xc0   :  { %v246_v34 = vsel %vm245_vm2, %v244_v27, %v243_v25  ;;  %v257_v37 = vsel %vm256_vm3, %v255_v31, %v254_v28  ;;  %vm421_vm2 = vcmask 285696   ;;  %vm432_vm3 = vcmask 293888  }
  0xc1   :  { %v237_v32 = vmax.f32 %v226_v29, %v235_v30  ;;  %v265_v33 = vpop.permute.xlu0 %264  ;;  %v276_v35 = vpop.permute.xlu1 %275 }
  0xc2   :  { %v266_v0 = vrot.slane %v265_v33, 4  ;;  %v277_v38 = vrot.slane %v276_v35, 4 }
  0xc3   :  { %v248_v36 = vmax.f32 %v237_v32, %v246_v34 }
  0xc4   :  { %v268_v41 = vsel %vm267_vm4, %v266_v0, %v265_v33  ;;  %v279_v45 = vsel %vm278_vm5, %v277_v38, %v276_v35  ;;  %vm443_vm4 = vcmask 302080   ;;  %vm454_vm5 = vcmask 310272  }
  0xc5   :  { %v259_v39 = vmax.f32 %v248_v36, %v257_v37  ;;  %v287_v40 = vpop.permute.xlu0 %286  ;;  %v298_v43 = vpop.permute.xlu1 %297 }
  0xc6   :  { %v288_v42 = vrot.slane %v287_v40, 4  ;;  %v299_v46 = vrot.slane %v298_v43, 4 }
  0xc7   :  { %v270_v44 = vmax.f32 %v259_v39, %v268_v41 }
  0xc8   :  { %v290_v49 = vsel %vm289_vm6, %v288_v42, %v287_v40  ;;  %v301_v53 = vsel %vm300_vm7, %v299_v46, %v298_v43  ;;  %vm465_vm6 = vcmask 318464   ;;  %vm476_vm7 = vcmask 326656  }
  0xc9   :  { %v281_v47 = vmax.f32 %v270_v44, %v279_v45  ;;  %v309_v48 = vpop.permute.xlu0 %308  ;;  %v320_v51 = vpop.permute.xlu1 %319 }
  0xca   :  { %v310_v50 = vrot.slane %v309_v48, 4  ;;  %v321_v54 = vrot.slane %v320_v51, 4 }
  0xcb   :  { %v292_v52 = vmax.f32 %v281_v47, %v290_v49 }
  0xcc   :  { %v312_v57 = vsel %vm311_vm8, %v310_v50, %v309_v48  ;;  %v323_v61 = vsel %vm322_vm9, %v321_v54, %v320_v51  ;;  %vm486_vm8 = vcmask 359424  }
  0xcd   :  { %v303_v55 = vmax.f32 %v292_v52, %v301_v53  ;;  %v331_v56 = vpop.permute.xlu0 %330  ;;  %v342_v59 = vpop.permute.xlu1 %341 }
  0xce   :  { %v332_v58 = vrot.slane %v331_v56, 4  ;;  %v343_v62 = vrot.slane %v342_v59, 4 }
  0xcf   :  { %v314_v60 = vmax.f32 %v303_v55, %v312_v57 }
  0xd0   :  { %v334_v2 = vsel %vm333_vm10, %v332_v58, %v331_v56  ;;  %v345_v6 = vsel %vm344_vm11, %v343_v62, %v342_v59 }
  0xd1   :  { %v325_v63 = vmax.f32 %v314_v60, %v323_v61  ;;  %v353_v1 = vpop.permute.xlu0 %352  ;;  %v364_v4 = vpop.permute.xlu1 %363 }
  0xd2   :  { %v354_v3 = vrot.slane %v353_v1, 4  ;;  %v365_v7 = vrot.slane %v364_v4, 4 }
  0xd3   :  { %v336_v5 = vmax.f32 %v325_v63, %v334_v2 }
  0xd4   :  { %v356_v10 = vsel %vm355_vm12, %v354_v3, %v353_v1  ;;  %v367_v14 = vsel %vm366_vm13, %v365_v7, %v364_v4 }
  0xd5   :  { %v347_v8 = vmax.f32 %v336_v5, %v345_v6  ;;  %v375_v9 = vpop.permute.xlu0 %374  ;;  %v386_v12 = vpop.permute.xlu1 %385 }
  0xd6   :  { %v376_v11 = vrot.slane %v375_v9, 4  ;;  %v387_v15 = vrot.slane %v386_v12, 4 }
  0xd7   :  { %v358_v13 = vmax.f32 %v347_v8, %v356_v10 }
  0xd8   :  { %v378_v18 = vsel %vm377_vm14, %v376_v11, %v375_v9  ;;  %v389_v22 = vsel %vm388_vm15, %v387_v15, %v386_v12 }
  0xd9   :  { %v369_v16 = vmax.f32 %v358_v13, %v367_v14  ;;  %v397_v17 = vpop.permute.xlu0 %396  ;;  %v408_v20 = vpop.permute.xlu1 %407 }
  0xda   :  { %v398_v19 = vrot.slane %v397_v17, 4  ;;  %v409_v23 = vrot.slane %v408_v20, 4 }
  0xdb   :  { %v380_v21 = vmax.f32 %v369_v16, %v378_v18 }
  0xdc   :  { %v400_v26 = vsel %vm399_vm0, %v398_v19, %v397_v17  ;;  %v411_v30 = vsel %vm410_vm1, %v409_v23, %v408_v20 }
  0xdd   :  { %v391_v24 = vmax.f32 %v380_v21, %v389_v22  ;;  %v419_v25 = vpop.permute.xlu0 %418  ;;  %v430_v28 = vpop.permute.xlu1 %429 }
  0xde   :  { %v420_v27 = vrot.slane %v419_v25, 4  ;;  %v431_v31 = vrot.slane %v430_v28, 4 }
  0xdf   :  { %v402_v29 = vmax.f32 %v391_v24, %v400_v26 }
  0xe0   :  { %v422_v34 = vsel %vm421_vm2, %v420_v27, %v419_v25  ;;  %v433_v37 = vsel %vm432_vm3, %v431_v31, %v430_v28 }
  0xe1   :  { %v413_v32 = vmax.f32 %v402_v29, %v411_v30  ;;  %v441_v33 = vpop.permute.xlu0 %440  ;;  %v452_v35 = vpop.permute.xlu1 %451 }
  0xe2   :  { %v442_v0 = vrot.slane %v441_v33, 4  ;;  %v453_v38 = vrot.slane %v452_v35, 4 }
  0xe3   :  { %v424_v36 = vmax.f32 %v413_v32, %v422_v34 }
  0xe4   :  { %v444_v41 = vsel %vm443_vm4, %v442_v0, %v441_v33  ;;  %v455_v45 = vsel %vm454_vm5, %v453_v38, %v452_v35 }
  0xe5   :  { %v435_v39 = vmax.f32 %v424_v36, %v433_v37  ;;  %v463_v40 = vpop.permute.xlu0 %462  ;;  %v474_v43 = vpop.permute.xlu1 %473 }
  0xe6   :  { %v464_v42 = vrot.slane %v463_v40, 4  ;;  %v475_v46 = vrot.slane %v474_v43, 4 }
  0xe7   :  { %v446_v44 = vmax.f32 %v435_v39, %v444_v41 }
  0xe8   :  { %v466_v48 = vsel %vm465_vm6, %v464_v42, %v463_v40  ;;  %v477_v50 = vsel %vm476_vm7, %v475_v46, %v474_v43 }
  0xe9   :  { %v457_v47 = vmax.f32 %v446_v44, %v455_v45 }
  0xeb   :  { %v468_v49 = vmax.f32 %v457_v47, %v466_v48 }
  0xed   :  { %v479_v51 = vmax.f32 %v468_v49, %v477_v50 }
  0xef   :  { %482 = vrot.lane.b32.xlu0 %v479_v51, %s692_s22  ;;  %v481_v52 = vcombine.high %v479_v51, %v479_v51 }
  0xf1   :  { %484 = vrot.lane.b32.xlu1 %v481_v52, %s692_s22 }
 0x161   :  { %v483_v53 = vpop.permute.xlu0 %482 }
 0x163   :  { %v485_v54 = vpop.permute.xlu1 %484 }
 0x164   :  { %v487_v55 = vsel %vm486_vm8, %v483_v53, %v485_v54 }
 0x165   :  { %489 = vst [vmem:[#allocation7] sm:$0x7] %v487_v55 }
 0x166   :  { %633 = shalt.err (!%p630_p1)
}
 0x167   :  { %s634_s28 = scalar_lea.hbm %s790_s2, 64 }
 0x168   :  { %p635_p2 = scmp.ne.s32.totalorder %s790_s2, %s634_s28  ;;  %p638_p3 = scmp.lt.u32.totalorder %s634_s28, %s790_s2 }
 0x16a   :  { %p640_p4 = pnand %p638_p3, %p635_p2 }
 0x16c   :  { %643 = shalt.err (!%p640_p4)
}
 0x16d   :  { %499 = dma.vmem_to_hbm [thread:$0]  %s497_s24, 64, %s790_s2, [#allocation4]  }
 0x16e   :  { %648 = dma.done.wait [#allocation4], 64  }
 0x16f   :  { %649 = vsyncadd [#allocation4], 4294967232 }
 0x170   :  { %503 = vsyncpa [#allocation3], 1 }
 0x171   :  { %504 = vsyncpa [#allocation4], 1 }
 0x172   :  { %505 = vsyncpa [#allocation5], 1 }

</bundles_post_ra>
